<compile_context>
chip_gen: v7x
topology: tpu7x:2x2x1
jax: 0.10.0
libtpu: 0.0.40
codegen_flags: <defaults>
</compile_context>

<pallas_src>
import functools

import jax
import jax.numpy as jnp
from jax import lax
from jax.experimental import pallas as pl
from jax.experimental.pallas import tpu as pltpu

LANE = 128
MAX_BLOCK_ROWS = 2048   # (2048,128) f32 block = 1 MiB per stream buffer


def _cdiv(a, b):
    return -(-a // b)


def _sublane_multiple(dtype):
    # f32/i32 -> 8, bf16/f16 -> 16, int8/uint8/bool -> 32 sublanes per tile.
    return max(8, 32 // jnp.dtype(dtype).itemsize)


def _combo_sums_kernel(x_ref, t_ref, out_ref, *, slots, hw, block_rows,
                       needs_mask):
    """One grid step: accumulate per-(channel,batch) partial sums.

    out_ref block: (1, 1, n_sums, 8, LANE) resident accumulator; slot order
    follows `slots` (a subset of ("p", "t", "pt", "bce", "focal")).
    """
    j = pl.program_id(2)                      # block index along the row axis

    @pl.when(j == 0)
    def _init():
        out_ref[...] = jnp.zeros_like(out_ref)

    x = x_ref[0, 0].astype(jnp.float32)       # (block_rows, LANE); bf16 input ok
    t_raw = t_ref[0, 0]                       # float / int8 / bool {0,1} masks
    tb = t_raw if t_raw.dtype == jnp.bool_ else (t_raw != 0)

    need_sigmoid = any(s in slots for s in ("p", "pt", "focal"))
    vals = {}

    e = None
    if need_sigmoid or "bce" in slots:
        e = jnp.exp(-jnp.abs(x))              # shared: stable sigmoid + softplus
    if need_sigmoid:
        r = pl.reciprocal(1.0 + e, approx=True)      # EUP slot, frees VALU
        p = jnp.where(x >= 0.0, r, e * r)            # sigmoid(x), stable
    if "p" in slots:
        vals["p"] = p
    if "t" in slots:
        vals["t"] = jnp.where(tb, 1.0, 0.0)
    if "pt" in slots:
        vals["pt"] = jnp.where(tb, p, 0.0)
    if "bce" in slots:
        # StableBCE: clamp(x,0) - x*t + log(1 + exp(-|x|)) (binary targets).
        vals["bce"] = jnp.maximum(x, 0.0) - jnp.where(tb, x, 0.0) + jnp.log1p(e)
    if "focal" in slots:
        # ComboLoss feeds sigmoid(x) to FocalLoss2d, which sigmoids AGAIN:
        # q = sigmoid(p) in (0.5, 0.74) so the 1e-8 clamp never binds.
        ep = jnp.exp(-p)
        q = pl.reciprocal(1.0 + ep, approx=True)
        one_m_qsel = jnp.where(tb, ep * q, q)                # 1 - q_sel
        log_qsel = -jnp.log1p(ep) - jnp.where(tb, 0.0, p)    # log(q_sel)
        vals["focal"] = -(one_m_qsel * one_m_qsel) * log_qsel  # gamma = 2

    # One-hot-row (8, block_rows) matrix: jnp.dot(reduce_mat, v) drops the
    # column sums of v into sublane 0.  Offloads the row reduction to the idle
    # MXU (HIGHEST = native f32 passes, preserves f32 accuracy of the sums).
    reduce_mat = (lax.broadcasted_iota(jnp.int32, (8, block_rows), 0) == 0
                  ).astype(jnp.float32)

    def _accumulate(mask):
        for idx, name in enumerate(slots):
            v = vals[name]
            if mask is not None:
                # where(), not v*mask: OOB tail rows may hold NaN/Inf garbage.
                v = jnp.where(mask, v, 0.0)
            out_ref[0, 0, idx] += jnp.dot(
                reduce_mat, v, preferred_element_type=jnp.float32,
                precision=lax.Precision.HIGHEST)

    if not needs_mask:
        _accumulate(None)
    else:
        last = pl.num_programs(2) - 1

        @pl.when(j != last)
        def _full():
            _accumulate(None)

        @pl.when(j == last)          # only the tail block carries invalid data
        def _tail():
            row = lax.broadcasted_iota(jnp.int32, (block_rows, LANE), 0)
            col = lax.broadcasted_iota(jnp.int32, (block_rows, LANE), 1)
            flat = (j * block_rows + row) * LANE + col   # int32: ok for hw < 2^31
            _accumulate(flat < hw)


def combo_loss(outputs, targets, weights, *,
               channel_weights=(1.0, 0.5, 0.5), channel_losses=None,
               max_block_rows=MAX_BLOCK_ROWS):
    """JAX/Pallas equivalent of ComboLoss.forward for binary {0,1} targets.

    Accepts f32/bf16 logits and float/int8/bool targets with no wrapper-side
    dtype-conversion HBM passes (casts happen on the VMEM block in-kernel).
    """
    for k in ("lovasz", "lovasz_sigmoid"):
        if weights.get(k, 0):
            # TODO(synk): lovasz / lovasz_sigmoid need a global per-image sort +
            # cumsum (lovasz_grad); no clean Pallas TPU equivalent implemented.
            raise NotImplementedError(f"{k} term is not implemented")

    w_bce = weights.get("bce", 0)
    w_dice = weights.get("dice", 0)
    w_jac = weights.get("jaccard", 0)
    w_focal = weights.get("focal", 0)

    slots = []                      # specialize kernel on enabled terms
    if w_dice or w_jac:
        slots += ["p", "t", "pt"]
    if w_bce:
        slots += ["bce"]
    if w_focal:
        slots += ["focal"]
    if not slots:
        return jnp.float32(1e-5)    # loss = 0 -> clamp(min=1e-5)
    slots = tuple(slots)

    B, C, H, W = outputs.shape
    hw = H * W
    n_total = B * C * hw

    x = outputs.reshape(B, C, hw)   # layout-free, keeps caller dtype
    t = targets.reshape(B, C, hw)

    rows = _cdiv(hw, LANE)
    pad = rows * LANE - hw
    if pad:                         # only when H*W is not a multiple of 128
        x = jnp.pad(x, ((0, 0), (0, 0), (0, pad)))
        t = jnp.pad(t, ((0, 0), (0, 0), (0, pad)))
    x = x.reshape(B, C, rows, LANE)
    t = t.reshape(B, C, rows, LANE)

    row_mult = max(_sublane_multiple(x.dtype), _sublane_multiple(t.dtype))
    max_rows = max(row_mult, (int(max_block_rows) // row_mult) * row_mult)
    if rows <= max_rows:
        block_rows, nblocks = rows, 1          # single full-dim block
    else:
        block_rows = max_rows
        nblocks = _cdiv(rows, block_rows)      # partial tail block allowed
    needs_mask = (nblocks * block_rows * LANE) != hw

    n_sums = len(slots)
    kernel = functools.partial(_combo_sums_kernel, slots=slots, hw=hw,
                               block_rows=block_rows, needs_mask=needs_mask)

    sums = pl.pallas_call(
        kernel,
        out_shape=jax.ShapeDtypeStruct((C, B, n_sums, 8, LANE), jnp.float32),
        grid_spec=pltpu.PrefetchScalarGridSpec(
            num_scalar_prefetch=0,
            grid=(C, B, nblocks),
            in_specs=[
                pl.BlockSpec((1, 1, block_rows, LANE),
                             lambda c, b, j: (b, c, j, 0)),
                pl.BlockSpec((1, 1, block_rows, LANE),
                             lambda c, b, j: (b, c, j, 0)),
            ],
            out_specs=pl.BlockSpec((1, 1, n_sums, 8, LANE),
                                   lambda c, b, j: (c, b, 0, 0, 0)),
        ),
        compiler_params=pltpu.CompilerParams(
            dimension_semantics=("parallel", "parallel", "arbitrary"),
            vmem_limit_bytes=64 * 1024 * 1024),
    )(x, t)

    per_c = jnp.sum(sums, axis=(1, 3, 4))            # (C, n_sums)
    col = {name: per_c[:, i] for i, name in enumerate(slots)}

    def _chan_w(loss_name):
        return jnp.asarray(
            [channel_weights[c]
             if (channel_losses is None or loss_name in channel_losses[c])
             else 0.0
             for c in range(C)], jnp.float32)

    loss = jnp.float32(0.0)
    if w_bce:
        loss = loss + w_bce * (jnp.sum(col["bce"]) / n_total)
    if w_dice:
        dice_c = 1.0 - (2.0 * col["pt"] + 1e-6) / (col["p"] + col["t"] + 1e-6)
        loss = loss + w_dice * jnp.sum(_chan_w("dice") * dice_c)
    if w_jac:
        jac_c = 1.0 - (col["pt"] + 1e-3) / (col["p"] + col["t"] - col["pt"] + 1e-3)
        loss = loss + w_jac * jnp.sum(_chan_w("jaccard") * jac_c)
    if w_focal:
        loss = loss + w_focal * (jnp.sum(col["focal"]) / n_total)
    return jnp.maximum(loss, 1e-5)


def _reference_combo(logits, targets, weights, channel_weights):
    """Pure-JAX mirror of ComboLoss.forward (bce / dice / jaccard / focal)."""
    x = logits.astype(jnp.float32)
    t = targets.astype(jnp.float32)
    sig = jax.nn.sigmoid(x)
    C = x.shape[1]
    loss = jnp.float32(0.0)
    if weights.get("bce", 0):
        bce = jnp.mean(jnp.maximum(x, 0.0) - x * t
                       + jnp.log1p(jnp.exp(-jnp.abs(x))))
        loss = loss + weights["bce"] * bce
    if weights.get("dice", 0):
        val = 0.0
        for c in range(C):
            p_c = sig[:, c].reshape(-1)
            t_c = t[:, c].reshape(-1)
            inter = jnp.sum(p_c * t_c)
            union = jnp.sum(p_c) + jnp.sum(t_c) + 1e-6
            val = val + channel_weights[c] * (1.0 - (2.0 * inter + 1e-6) / union)
        loss = loss + weights["dice"] * val
    if weights.get("jaccard", 0):
        val = 0.0
        for c in range(C):
            p_c = sig[:, c].reshape(-1)
            t_c = t[:, c].reshape(-1)
            inter = jnp.sum(p_c * t_c)
            val = val + channel_weights[c] * (
                1.0 - (inter + 1e-3) / (jnp.sum(p_c + t_c) - inter + 1e-3))
        loss = loss + weights["jaccard"] * val
    if weights.get("focal", 0):
        q = jax.nn.sigmoid(sig)                 # ComboLoss double-sigmoid quirk
        q_sel = jnp.where(t == 1.0, q, 1.0 - q)
        q_sel = jnp.clip(q_sel, 1e-8, 1.0 - 1e-8)
        foc = jnp.mean(-((1.0 - q_sel) ** 2) * jnp.log(q_sel))
        loss = loss + weights["focal"] * foc
    return jnp.maximum(loss, 1e-5)


if __name__ == "__main__":
    key = jax.random.PRNGKey(0)
    k1, k2, k3, k4 = jax.random.split(key, 4)
    cw = [1.0, 0.5, 0.5]
    weights = {"bce": 1.0, "dice": 0.5, "focal": 2.0, "jaccard": 0.3,
               "lovasz": 0.0, "lovasz_sigmoid": 0.0}

    def _check(logits, targets, w, **kw):
        out = jax.block_until_ready(combo_loss(logits, targets, w, **kw))
        ref = _reference_combo(logits, targets, w, cw)
        # rtol budget covers the EUP approximate-reciprocal path.
        assert jnp.allclose(out, ref, rtol=2e-3, atol=1e-5), (out, ref)
        return out

    # 1) All terms, single full-dim block (hw = 256 -> 2 rows x 128 lanes).
    B, C, H, W = 2, 3, 16, 16
    logits = jax.random.normal(k1, (B, C, H, W), dtype=jnp.float32) * 3.0
    targets_f32 = jax.random.bernoulli(k2, 0.5, (B, C, H, W)).astype(jnp.float32)
    _check(logits, targets_f32, weights)

    # 2) Term specialization: only bce + dice enabled (focal/jaccard skipped).
    _check(logits, targets_f32, {"bce": 1.0, "dice": 0.5})

    # 3) Non-128-multiple spatial size: pad path + multi-block + masked tail.
    B2, C2, H2, W2 = 2, 3, 33, 33
    logits2 = jax.random.normal(k3, (B2, C2, H2, W2), dtype=jnp.float32) * 3.0
    targets2 = jax.random.bernoulli(k4, 0.5, (B2, C2, H2, W2)).astype(jnp.float32)
    _check(logits2, targets2, weights, max_block_rows=8)

    # 4) Compact int8 targets (no wrapper-side conversion pass).
    _check(logits, targets_f32.astype(jnp.int8), weights)

    print("KERNEL_OK")
</pallas_src>

<mosaic_0001>
module attributes {stable_mosaic.version = 11 : i64} {
  func.func @_combo_sums_kernel(%arg0: i32, %arg1: i32, %arg2: i32, %arg3: memref<1x1x2x128xf32, #tpu.memory_space<vmem>>, %arg4: memref<1x1x2x128xf32, #tpu.memory_space<vmem>>, %arg5: memref<1x1x5x8x128xf32, #tpu.memory_space<vmem>>) attributes {dimension_semantics = [#tpu.dimension_semantics<parallel>, #tpu.dimension_semantics<parallel>, #tpu.dimension_semantics<arbitrary>], iteration_bounds = array<i64: 3, 2, 1>, scalar_prefetch = 0 : i64, scratch_operands = 0 : i64, tpu.core_type = #tpu.core_type<tc>, window_params = [{transform_indices = @transform_0, window_bounds = array<i64: 1, 1, 2, 128>}, {transform_indices = @transform_1, window_bounds = array<i64: 1, 1, 2, 128>}, {transform_indices = @transform_2, window_bounds = array<i64: 1, 1, 5, 8, 128>}]} {
    %c0_i32 = arith.constant 0 : i32
    %0 = arith.cmpi eq, %arg2, %c0_i32 : i32
    %1 = arith.extui %0 : i1 to i32
    %c0_i32_0 = arith.constant 0 : i32
    %2 = arith.cmpi ne, %1, %c0_i32_0 : i32
    scf.if %2 {
      %cst_73 = arith.constant 0.000000e+00 : f32
      %90 = vector.broadcast %cst_73 : f32 to vector<1x1x5x8x128xf32>
      %c0_74 = arith.constant 0 : index
      %c0_75 = arith.constant 0 : index
      %c0_76 = arith.constant 0 : index
      %c0_77 = arith.constant 0 : index
      %c0_78 = arith.constant 0 : index
      %91 = vector.load %arg5[%c0_74, %c0_75, %c0_76, %c0_77, %c0_78] : memref<1x1x5x8x128xf32, #tpu.memory_space<vmem>>, vector<1x1x5x8x128xf32>
      tpu.vector_store %arg5[%c0_74, %c0_75, %c0_76, %c0_77, %c0_78], %90 {strides = array<i32>} : memref<1x1x5x8x128xf32, #tpu.memory_space<vmem>>, vector<1x1x5x8x128xf32>,
    } else {
    }
    %c0 = arith.constant 0 : index
    %c0_1 = arith.constant 0 : index
    %c0_2 = arith.constant 0 : index
    %c0_3 = arith.constant 0 : index
    %3 = vector.load %arg3[%c0, %c0_1, %c0_2, %c0_3] : memref<1x1x2x128xf32, #tpu.memory_space<vmem>>, vector<1x1x2x128xf32>
    %4 = vector.shape_cast %3 : vector<1x1x2x128xf32> to vector<2x128xf32>
    %c0_4 = arith.constant 0 : index
    %c0_5 = arith.constant 0 : index
    %c0_6 = arith.constant 0 : index
    %c0_7 = arith.constant 0 : index
    %5 = vector.load %arg4[%c0_4, %c0_5, %c0_6, %c0_7] : memref<1x1x2x128xf32, #tpu.memory_space<vmem>>, vector<1x1x2x128xf32>
    %6 = vector.shape_cast %5 : vector<1x1x2x128xf32> to vector<2x128xf32>
    %cst = arith.constant 0.000000e+00 : f32
    %7 = vector.broadcast %cst : f32 to vector<2x128xf32>
    %8 = arith.cmpf one, %6, %7 : vector<2x128xf32>
    %9 = math.absf %4 : vector<2x128xf32>
    %cst_8 = arith.constant 0.000000e+00 : f32
    %10 = vector.broadcast %cst_8 : f32 to vector<2x128xf32>
    %11 = arith.subf %10, %9 : vector<2x128xf32>
    %12 = math.exp %11 : vector<2x128xf32>
    %cst_9 = arith.constant 1.000000e+00 : f32
    %13 = vector.broadcast %cst_9 : f32 to vector<2x128xf32>
    %14 = arith.addf %13, %12 : vector<2x128xf32>
    %15 = tpu.reciprocal %14 {approx = true} : vector<2x128xf32> -> vector<2x128xf32>
    %cst_10 = arith.constant 0.000000e+00 : f32
    %16 = vector.broadcast %cst_10 : f32 to vector<2x128xf32>
    %17 = arith.cmpf oge, %4, %16 : vector<2x128xf32>
    %18 = arith.mulf %12, %15 : vector<2x128xf32>
    %19 = arith.select %17, %15, %18 : vector<2x128xi1>, vector<2x128xf32>
    %cst_11 = arith.constant 1.000000e+00 : f32
    %cst_12 = arith.constant 0.000000e+00 : f32
    %20 = vector.broadcast %cst_11 : f32 to vector<2x128xf32>
    %21 = vector.broadcast %cst_12 : f32 to vector<2x128xf32>
    %22 = arith.select %8, %20, %21 : vector<2x128xi1>, vector<2x128xf32>
    %cst_13 = arith.constant 0.000000e+00 : f32
    %23 = vector.broadcast %cst_13 : f32 to vector<2x128xf32>
    %24 = arith.select %8, %19, %23 : vector<2x128xi1>, vector<2x128xf32>
    %cst_14 = arith.constant 0.000000e+00 : f32
    %25 = vector.broadcast %cst_14 : f32 to vector<2x128xf32>
    %26 = arith.maximumf %4, %25 : vector<2x128xf32>
    %cst_15 = arith.constant 0.000000e+00 : f32
    %27 = vector.broadcast %cst_15 : f32 to vector<2x128xf32>
    %28 = arith.select %8, %4, %27 : vector<2x128xi1>, vector<2x128xf32>
    %29 = arith.subf %26, %28 : vector<2x128xf32>
    %30 = math.log1p %12 : vector<2x128xf32>
    %31 = arith.addf %29, %30 : vector<2x128xf32>
    %cst_16 = arith.constant 0.000000e+00 : f32
    %32 = vector.broadcast %cst_16 : f32 to vector<2x128xf32>
    %33 = arith.subf %32, %19 : vector<2x128xf32>
    %34 = math.exp %33 : vector<2x128xf32>
    %cst_17 = arith.constant 1.000000e+00 : f32
    %35 = vector.broadcast %cst_17 : f32 to vector<2x128xf32>
    %36 = arith.addf %35, %34 : vector<2x128xf32>
    %37 = tpu.reciprocal %36 {approx = true} : vector<2x128xf32> -> vector<2x128xf32>
    %38 = arith.mulf %34, %37 : vector<2x128xf32>
    %39 = arith.select %8, %38, %37 : vector<2x128xi1>, vector<2x128xf32>
    %40 = math.log1p %34 : vector<2x128xf32>
    %cst_18 = arith.constant 0.000000e+00 : f32
    %41 = vector.broadcast %cst_18 : f32 to vector<2x128xf32>
    %42 = arith.subf %41, %40 : vector<2x128xf32>
    %cst_19 = arith.constant 0.000000e+00 : f32
    %43 = vector.broadcast %cst_19 : f32 to vector<2x128xf32>
    %44 = arith.select %8, %43, %19 : vector<2x128xi1>, vector<2x128xf32>
    %45 = arith.subf %42, %44 : vector<2x128xf32>
    %46 = arith.mulf %39, %39 : vector<2x128xf32>
    %cst_20 = arith.constant 0.000000e+00 : f32
    %47 = vector.broadcast %cst_20 : f32 to vector<2x128xf32>
    %48 = arith.subf %47, %46 : vector<2x128xf32>
    %49 = arith.mulf %48, %45 : vector<2x128xf32>
    %50 = tpu.iota {dimensions = array<i32: 0>} : vector<8x2xi32>
    %c0_i32_21 = arith.constant 0 : i32
    %51 = vector.broadcast %c0_i32_21 : i32 to vector<8x2xi32>
    %52 = arith.cmpi eq, %50, %51 : vector<8x2xi32>
    %53 = arith.extui %52 : vector<8x2xi1> to vector<8x2xi32>
    %54 = arith.sitofp %53 : vector<8x2xi32> to vector<8x2xf32>
    %c0_22 = arith.constant 0 : index
    %c0_23 = arith.constant 0 : index
    %c0_24 = arith.constant 0 : index
    %c0_25 = arith.constant 0 : index
    %c0_26 = arith.constant 0 : index
    %55 = vector.load %arg5[%c0_22, %c0_23, %c0_24, %c0_25, %c0_26] : memref<1x1x5x8x128xf32, #tpu.memory_space<vmem>>, vector<1x1x1x8x128xf32>
    %56 = vector.shape_cast %55 : vector<1x1x1x8x128xf32> to vector<8x128xf32>
    %cst_27 = arith.constant dense<0.000000e+00> : vector<8x128xf32>
    %57 = tpu.matmul %54, %19, %cst_27 {dimension_numbers = #tpu.dot_dimension_numbers<[1], [0], [0], [1], [0, 0, 1, 1], [], []>, precision = #tpu.contract_precision<fp32>} : vector<8x2xf32>, vector<2x128xf32>, vector<8x128xf32> -> vector<8x128xf32>
    %58 = arith.addf %56, %57 : vector<8x128xf32>
    %c0_28 = arith.constant 0 : index
    %c0_29 = arith.constant 0 : index
    %c0_30 = arith.constant 0 : index
    %c0_31 = arith.constant 0 : index
    %c0_32 = arith.constant 0 : index
    %59 = vector.load %arg5[%c0_28, %c0_29, %c0_30, %c0_31, %c0_32] : memref<1x1x5x8x128xf32, #tpu.memory_space<vmem>>, vector<1x1x1x8x128xf32>
    %60 = vector.shape_cast %59 : vector<1x1x1x8x128xf32> to vector<8x128xf32>
    %61 = vector.shape_cast %58 : vector<8x128xf32> to vector<1x1x1x8x128xf32>
    tpu.vector_store %arg5[%c0_28, %c0_29, %c0_30, %c0_31, %c0_32], %61 {strides = array<i32>} : memref<1x1x5x8x128xf32, #tpu.memory_space<vmem>>, vector<1x1x1x8x128xf32>,
    %c0_33 = arith.constant 0 : index
    %c0_34 = arith.constant 0 : index
    %c1 = arith.constant 1 : index
    %c0_35 = arith.constant 0 : index
    %c0_36 = arith.constant 0 : index
    %62 = vector.load %arg5[%c0_33, %c0_34, %c1, %c0_35, %c0_36] : memref<1x1x5x8x128xf32, #tpu.memory_space<vmem>>, vector<1x1x1x8x128xf32>
    %63 = vector.shape_cast %62 : vector<1x1x1x8x128xf32> to vector<8x128xf32>
    %cst_37 = arith.constant dense<0.000000e+00> : vector<8x128xf32>
    %64 = tpu.matmul %54, %22, %cst_37 {dimension_numbers = #tpu.dot_dimension_numbers<[1], [0], [0], [1], [0, 0, 1, 1], [], []>, precision = #tpu.contract_precision<fp32>} : vector<8x2xf32>, vector<2x128xf32>, vector<8x128xf32> -> vector<8x128xf32>
    %65 = arith.addf %63, %64 : vector<8x128xf32>
    %c0_38 = arith.constant 0 : index
    %c0_39 = arith.constant 0 : index
    %c1_40 = arith.constant 1 : index
    %c0_41 = arith.constant 0 : index
    %c0_42 = arith.constant 0 : index
    %66 = vector.load %arg5[%c0_38, %c0_39, %c1_40, %c0_41, %c0_42] : memref<1x1x5x8x128xf32, #tpu.memory_space<vmem>>, vector<1x1x1x8x128xf32>
    %67 = vector.shape_cast %66 : vector<1x1x1x8x128xf32> to vector<8x128xf32>
    %68 = vector.shape_cast %65 : vector<8x128xf32> to vector<1x1x1x8x128xf32>
    tpu.vector_store %arg5[%c0_38, %c0_39, %c1_40, %c0_41, %c0_42], %68 {strides = array<i32>} : memref<1x1x5x8x128xf32, #tpu.memory_space<vmem>>, vector<1x1x1x8x128xf32>,
    %c0_43 = arith.constant 0 : index
    %c0_44 = arith.constant 0 : index
    %c2 = arith.constant 2 : index
    %c0_45 = arith.constant 0 : index
    %c0_46 = arith.constant 0 : index
    %69 = vector.load %arg5[%c0_43, %c0_44, %c2, %c0_45, %c0_46] : memref<1x1x5x8x128xf32, #tpu.memory_space<vmem>>, vector<1x1x1x8x128xf32>
    %70 = vector.shape_cast %69 : vector<1x1x1x8x128xf32> to vector<8x128xf32>
    %cst_47 = arith.constant dense<0.000000e+00> : vector<8x128xf32>
    %71 = tpu.matmul %54, %24, %cst_47 {dimension_numbers = #tpu.dot_dimension_numbers<[1], [0], [0], [1], [0, 0, 1, 1], [], []>, precision = #tpu.contract_precision<fp32>} : vector<8x2xf32>, vector<2x128xf32>, vector<8x128xf32> -> vector<8x128xf32>
    %72 = arith.addf %70, %71 : vector<8x128xf32>
    %c0_48 = arith.constant 0 : index
    %c0_49 = arith.constant 0 : index
    %c2_50 = arith.constant 2 : index
    %c0_51 = arith.constant 0 : index
    %c0_52 = arith.constant 0 : index
    %73 = vector.load %arg5[%c0_48, %c0_49, %c2_50, %c0_51, %c0_52] : memref<1x1x5x8x128xf32, #tpu.memory_space<vmem>>, vector<1x1x1x8x128xf32>
    %74 = vector.shape_cast %73 : vector<1x1x1x8x128xf32> to vector<8x128xf32>
    %75 = vector.shape_cast %72 : vector<8x128xf32> to vector<1x1x1x8x128xf32>
    tpu.vector_store %arg5[%c0_48, %c0_49, %c2_50, %c0_51, %c0_52], %75 {strides = array<i32>} : memref<1x1x5x8x128xf32, #tpu.memory_space<vmem>>, vector<1x1x1x8x128xf32>,
    %c0_53 = arith.constant 0 : index
    %c0_54 = arith.constant 0 : index
    %c3 = arith.constant 3 : index
    %c0_55 = arith.constant 0 : index
    %c0_56 = arith.constant 0 : index
    %76 = vector.load %arg5[%c0_53, %c0_54, %c3, %c0_55, %c0_56] : memref<1x1x5x8x128xf32, #tpu.memory_space<vmem>>, vector<1x1x1x8x128xf32>
    %77 = vector.shape_cast %76 : vector<1x1x1x8x128xf32> to vector<8x128xf32>
    %cst_57 = arith.constant dense<0.000000e+00> : vector<8x128xf32>
    %78 = tpu.matmul %54, %31, %cst_57 {dimension_numbers = #tpu.dot_dimension_numbers<[1], [0], [0], [1], [0, 0, 1, 1], [], []>, precision = #tpu.contract_precision<fp32>} : vector<8x2xf32>, vector<2x128xf32>, vector<8x128xf32> -> vector<8x128xf32>
    %79 = arith.addf %77, %78 : vector<8x128xf32>
    %c0_58 = arith.constant 0 : index
    %c0_59 = arith.constant 0 : index
    %c3_60 = arith.constant 3 : index
    %c0_61 = arith.constant 0 : index
    %c0_62 = arith.constant 0 : index
    %80 = vector.load %arg5[%c0_58, %c0_59, %c3_60, %c0_61, %c0_62] : memref<1x1x5x8x128xf32, #tpu.memory_space<vmem>>, vector<1x1x1x8x128xf32>
    %81 = vector.shape_cast %80 : vector<1x1x1x8x128xf32> to vector<8x128xf32>
    %82 = vector.shape_cast %79 : vector<8x128xf32> to vector<1x1x1x8x128xf32>
    tpu.vector_store %arg5[%c0_58, %c0_59, %c3_60, %c0_61, %c0_62], %82 {strides = array<i32>} : memref<1x1x5x8x128xf32, #tpu.memory_space<vmem>>, vector<1x1x1x8x128xf32>,
    %c0_63 = arith.constant 0 : index
    %c0_64 = arith.constant 0 : index
    %c4 = arith.constant 4 : index
    %c0_65 = arith.constant 0 : index
    %c0_66 = arith.constant 0 : index
    %83 = vector.load %arg5[%c0_63, %c0_64, %c4, %c0_65, %c0_66] : memref<1x1x5x8x128xf32, #tpu.memory_space<vmem>>, vector<1x1x1x8x128xf32>
    %84 = vector.shape_cast %83 : vector<1x1x1x8x128xf32> to vector<8x128xf32>
    %cst_67 = arith.constant dense<0.000000e+00> : vector<8x128xf32>
    %85 = tpu.matmul %54, %49, %cst_67 {dimension_numbers = #tpu.dot_dimension_numbers<[1], [0], [0], [1], [0, 0, 1, 1], [], []>, precision = #tpu.contract_precision<fp32>} : vector<8x2xf32>, vector<2x128xf32>, vector<8x128xf32> -> vector<8x128xf32>
    %86 = arith.addf %84, %85 : vector<8x128xf32>
    %c0_68 = arith.constant 0 : index
    %c0_69 = arith.constant 0 : index
    %c4_70 = arith.constant 4 : index
    %c0_71 = arith.constant 0 : index
    %c0_72 = arith.constant 0 : index
    %87 = vector.load %arg5[%c0_68, %c0_69, %c4_70, %c0_71, %c0_72] : memref<1x1x5x8x128xf32, #tpu.memory_space<vmem>>, vector<1x1x1x8x128xf32>
    %88 = vector.shape_cast %87 : vector<1x1x1x8x128xf32> to vector<8x128xf32>
    %89 = vector.shape_cast %86 : vector<8x128xf32> to vector<1x1x1x8x128xf32>
    tpu.vector_store %arg5[%c0_68, %c0_69, %c4_70, %c0_71, %c0_72], %89 {strides = array<i32>} : memref<1x1x5x8x128xf32, #tpu.memory_space<vmem>>, vector<1x1x1x8x128xf32>,
    return
  }
  func.func @transform_0(%arg0: i32, %arg1: i32, %arg2: i32) -> (i32, i32, i32, i32) {
    %c0_i32 = arith.constant 0 : i32
    %c0_i32_0 = arith.constant 0 : i32
    return %arg1, %arg0, %arg2, %c0_i32 : i32, i32, i32, i32
  }
  func.func @transform_1(%arg0: i32, %arg1: i32, %arg2: i32) -> (i32, i32, i32, i32) {
    %c0_i32 = arith.constant 0 : i32
    %c0_i32_0 = arith.constant 0 : i32
    return %arg1, %arg0, %arg2, %c0_i32 : i32, i32, i32, i32
  }
  func.func @transform_2(%arg0: i32, %arg1: i32, %arg2: i32) -> (i32, i32, i32, i32, i32) {
    %c0_i32 = arith.constant 0 : i32
    %c0_i32_0 = arith.constant 0 : i32
    %c0_i32_1 = arith.constant 0 : i32
    %c0_i32_2 = arith.constant 0 : i32
    return %arg0, %arg1, %c0_i32, %c0_i32_0, %c0_i32_1 : i32, i32, i32, i32, i32
  }
}

</mosaic_0001>

<bundles_post_ra>
// kernel: tpu_custom_call.1
= control target key start
LH: loop header
LB: loop body
LE: loop exit
PB: predicated region body
PF: predicated region fallthrough
CT: control target
= control target key end

     0   :  { %7 = vsyncpa [#allocation3], 0  ;;  %s3706_s0 = inlined_call_operand.hbm [shape: f32[2,3,2,128], index: 0, kind: input, shape index: {}]   ;;  %s3707_s1 = inlined_call_operand.hbm [shape: f32[2,3,2,128], index: 1, kind: input, shape index: {}]   ;;  %s3708_s2 = inlined_call_operand.hbm [shape: f32[3,2,5,8,128], index: 2, kind: output, shape index: {}]  }
   0x1   :  { %9 = vsyncpa [#allocation3 + $0x1], 0 }
   0x2   :  { %10 = vsyncpa [#allocation6], 0 }
   0x3   :  { %12 = vsyncpa [#allocation6 + $0x1], 0 }
   0x4   :  { %13 = vsyncpa [#allocation4], 0 }
   0x5   :  { %15 = vsyncpa [#allocation4 + $0x1], 0  ;;  %s3239_s9 = smov 0   ;;  %s3241_s10 = smov 0  }
   0x6   :  { %s3243_s11 = smov 0   ;;  %s3245_s12 = smov 0  }
   0x7   :  { %s3247_s13 = smov 0   ;;  %s3249_s14 = smov 0  }
   0x8   :  { %s3251_s15 = smov 0   ;;  %s3253_s16 = smov 0  }
   0x9 LB: > { %s2698_s17 = sadd.s32 4294967295, %s3215_s16   ;;  %s2699_s18 = sadd.s32 4294967294, %s3215_s16   ;;  %s3215_s16 = sphi %s3253_s16, %s21_s16   ;;  %s3211_s15 = sphi %s3251_s15, %s3734_s15   ;;  %s3207_s14 = sphi %s3249_s14, %s3733_s14   ;;  %s3203_s13 = sphi %s3247_s13, %s3732_s13   ;;  %s3199_s12 = sphi %s3245_s12, %s3731_s12   ;;  %s3195_s11 = sphi %s3243_s11, %s3730_s11   ;;  %s3191_s10 = sphi %s3241_s10, %s3729_s10   ;;  %s3187_s9 = sphi %s3239_s9, %s3728_s9  }
   0xa   : > { %s36_s19 = sadd.s32 1, %s3207_s14  ;;  %s40_s20 = sadd.s32 1, %s3211_s15 }
   0xb   : > { %p38_p0 = scmp.ge.s32.totalorder %s36_s19, 2  ;;  %s51_s21 = sadd.s32 1, %s3195_s11 }
   0xc   : > { %p58_p1 = scmp.ne.s32.totalorder %s3195_s11, %s3191_s10  ;;  %p59_p2 = scmp.eq.s32.totalorder %s3215_s16, 0 }
   0xd   : > { %s3736_s19 = smov (%p38_p0, %s36_s19), 0  ;;  %s3738_s20 = smov (!%p38_p0, %s40_s20), %s3211_s15 }
   0xe   : > { %s44_s22 = ssub.s32 %s3207_s14, %s3736_s19  ;;  %p3292_p3 = por %p59_p2, %p58_p1 }
   0xf   : > { %p42_p4 = scmp.ge.s32.totalorder %s3738_s20, 3  ;;  %p64_p5 = scmp.ne.s32.totalorder %s3191_s10, %s3187_s9 }
  0x10   : > { %p65_p6 = scmp.eq.s32.totalorder %s2698_s17, 0  ;;  %p120_p7 = scmp.eq.s32.totalorder %s2698_s17, 5 }
  0x11   : > { %s3740_s20 = smov (%p42_p4, %s3738_s20), 0  ;;  %p126_p10 = scmp.eq.s32.totalorder %s2699_s18, 5 }
  0x12   : > { %p3300_p8 = por %p65_p6, %p64_p5  ;;  %p3304_p9 = por %p120_p7, %p58_p1 }
  0x13   : > { %s45_s26 = ssub.s32 %s3211_s15, %s3740_s20  ;;  %p3310_p12 = por %p126_p10, %p64_p5 }
  0x14   : > { %s3713_s24 = scalar_select %p3300_p8, 1, 0 }
  0x15   : > { %s3714_s25 = scalar_select %p3304_p9, 1, 0 }
  0x16   : > { %s46_s27 = sor.u32 %s45_s26, %s44_s22  ;;  %p2971_p13 = scmp.lt.s32.totalorder %s3215_s16, 6 }
  0x17   : > { %p49_p11 = scmp.eq.s32.totalorder %s46_s27, 0  ;;  %s3316_s29 = sand.u32 1, %s3195_s11  }
  0x18   : > { %s3715_s28 = scalar_select %p3310_p12, 1, 0 }
  0x19   : > { %s3319_s30 = scalar_select %p49_p11, %s3195_s11, %s51_s21  }
  0x1a   : > { %s3709_s3 = sshll.u32 %s3316_s29, 1  ;;  %s2949_s4 = smul.u32 3, %s3207_s14 }
  0x1b   : > { %s150_s5 = scalar_lea.vmem [#allocation2], %s3709_s3  ;;  %p3327_p0 = pnand %p2971_p13, %p3292_p3 }
  0x1c   : > { %s160_s6 = sshll.u32 %s150_s5, 4  ;;  %s3332_s8 = sadd.s32 %s3211_s15, %s2949_s4  ;;  %s3334_s6 = int_to_ptr.vmem [resolvable:$true] %s160_s6 }
  0x1d   : > { %s2703_s17 = sshll.u32 %s3332_s8, 5  ;;  %s147_s23 = scalar_lea.sflag [#allocation3], %s3316_s29 }
  0x1e   : > { %s3342_s22 = scalar_lea.hbm %s3706_s0, %s2703_s17  ;;  %p3055_p3 = pneg %p3327_p0 }
  0x1f   : > { %s3053_s26 = scalar_lea.hbm %s3342_s22, 32  ;;  %s3058_s5 = scalar_lea.hbm %s3706_s0, 192 }
  0x20   : > { %p3054_p2 = scmp.ne.s32.totalorder %s3342_s22, %s3053_s26  ;;  %p3059_p6 = scmp.lt.u32.totalorder %s3342_s22, %s3706_s0 }
  0x21   : > { %p3060_p7 = scmp.lt.u32.totalorder %s3058_s5, %s3053_s26  ;;  %p3062_p11 = scmp.lt.u32.totalorder %s3053_s26, %s3342_s22 }
  0x22   : > { %p3056_p4 = pnand %p3055_p3, %p3054_p2 }
  0x23   : > { %p3061_p10 = por %p3060_p7, %p3059_p6 }
  0x24   : > { %p3057_p5 = pneg %p3056_p4 }
  0x25   : > { %p3063_p13 = por %p3062_p11, %p3061_p10 }
  0x27   : > { %p3064_p1 = pnand %p3063_p13, %p3057_p5 }
  0x29   : > { %3067 = shalt.err (!%p3064_p1)
}
  0x2a   : > { %s3068_s3 = scalar_lea.vmem %s3334_s6, 32  ;;  %s3217_s27 = smov [#allocation2]  }
  0x2b   : > { %p3069_p2 = scmp.ne.s32.totalorder %s3334_s6, %s3068_s3  ;;  %s3073_s4 = sshll.u32 %s3217_s27, 4  ;;  %s3074_s4 = int_to_ptr.vmem [resolvable:$false] %s3073_s4 }
  0x2c   : > { %s3075_s18 = scalar_lea.vmem %s3074_s4, 64  ;;  %p3076_p9 = scmp.lt.s32.totalorder %s3334_s6, %s3074_s4 }
  0x2d   : > { %p3071_p4 = pnand %p3069_p2, %p3055_p3  ;;  %p3077_p6 = scmp.lt.s32.totalorder %s3075_s18, %s3068_s3 }
  0x2f   : > { %p3072_p12 = pneg %p3071_p4  ;;  %p3078_p7 = por %p3077_p6, %p3076_p9 }
  0x31   : > { %p3079_p10 = pnand %p3078_p7, %p3072_p12 }
  0x33   : > { %3082 = shalt.err (!%p3079_p10)
}
  0x34   : > { %2963 = dma.hbm_to_vmem [thread:$0]  (!%p3327_p0), %s3342_s22, 32, %s3334_s6, %s147_s23  }
  0x35   : > { %p186_p1 = scmp.lt.s32.totalorder %s3215_s16, 7  ;;  %s3377_s3 = scalar_lea.hbm %s3707_s1, %s2703_s17 }
  0x36   : > { %p3717_p9 = scmp.ge.s32.totalorder %s3215_s16, 1  ;;  %s3719_s27 = sshll.u32 %s3316_s29, 1 }
  0x37   : > { %s171_s4 = scalar_lea.vmem [#allocation5], %s3719_s27  ;;  %s168_s6 = scalar_lea.sflag [#allocation6], %s3316_s29 }
  0x38   : > { %p3381_p12 = pnand %p3717_p9, %p186_p1  ;;  %s181_s18 = sshll.u32 %s171_s4, 4  ;;  %s182_s18 = int_to_ptr.vmem [resolvable:$true] %s181_s18 }
  0x39   : > { %s3083_s8 = scalar_lea.hbm %s3377_s3, 32  ;;  %s3088_s23 = scalar_lea.hbm %s3707_s1, 192 }
  0x3a   : > { %s3718_s21 = scalar_select %p3381_p12, 1, 0 }
  0x3b   : > { %p3084_p5 = scmp.ne.s32.totalorder %s3377_s3, %s3083_s8  ;;  %p3089_p2 = scmp.lt.u32.totalorder %s3377_s3, %s3707_s1 }
  0x3c   : > { %p3090_p4 = scmp.lt.u32.totalorder %s3088_s23, %s3083_s8  ;;  %p3092_p7 = scmp.lt.u32.totalorder %s3083_s8, %s3377_s3 }
  0x3d   : > { %p3086_p11 = pnand %p3084_p5, %p3055_p3 }
  0x3e   : > { %p3091_p6 = por %p3090_p4, %p3089_p2 }
  0x3f   : > { %p3087_p13 = pneg %p3086_p11 }
  0x40   : > { %p3093_p10 = por %p3092_p7, %p3091_p6 }
  0x42   : > { %p3094_p1 = pnand %p3093_p10, %p3087_p13 }
  0x44   : > { %3097 = shalt.err (!%p3094_p1)
}
  0x45   : > { %s3098_s29 = scalar_lea.vmem %s182_s18, 32  ;;  %s3218_s27 = smov [#allocation5]  }
  0x46   : > { %p3099_p9 = scmp.ne.s32.totalorder %s182_s18, %s3098_s29  ;;  %s3103_s4 = sshll.u32 %s3218_s27, 4  ;;  %s3104_s4 = int_to_ptr.vmem [resolvable:$false] %s3103_s4 }
  0x47   : > { %s3105_s17 = scalar_lea.vmem %s3104_s4, 64  ;;  %p3106_p8 = scmp.lt.s32.totalorder %s182_s18, %s3104_s4 }
  0x48   : > { %p3101_p5 = pnand %p3099_p9, %p3055_p3  ;;  %p3107_p12 = scmp.lt.s32.totalorder %s3105_s17, %s3098_s29 }
  0x4a   : > { %p3102_p11 = pneg %p3101_p5  ;;  %p3108_p2 = por %p3107_p12, %p3106_p8 }
  0x4c   : > { %p3109_p4 = pnand %p3108_p2, %p3102_p11 }
  0x4e   : > { %3112 = shalt.err (!%p3109_p4)
}
  0x4f   : > { %2966 = dma.hbm_to_vmem [thread:$0]  (!%p3327_p0), %s3377_s3, 32, %s182_s18, %s168_s6  }
  0x50   : > { %p3720_p13 = scmp.ne.s32.totalorder %s3718_s21, 0 }
  0x51   : > { %s3410_s8 = sand.u32 (!%p3720_p13), 1, %s3191_s10   ;;  %p3721_p3 = scmp.ne.s32.totalorder (!%p3720_p13), %s3713_s24, 0 }
  0x52   : > { %190 = sbr.rel (%p3720_p13) target bundleno = 423 (0x1a7), region = 28  ;;  %s2707_s22 = sshll.u32 (!%p3720_p13), %s3410_s8, 1 }
  0x53   : > { %s193_s23 = scalar_lea.sflag (!%p3720_p13), [#allocation3], %s3410_s8  ;;  %s196_s26 = scalar_lea.vmem (!%p3720_p13), [#allocation2], %s2707_s22 }
  0x59   : > { %3174 = dma.done.wait (%p3721_p3), %s193_s23, 32  }
  0x5a   : > { %3176 = vsyncadd (%p3721_p3), %s193_s23, 4294967264  ;;  %s202_s7 = scalar_lea.sflag [#allocation6], %s3410_s8  ;;  %s205_s3 = scalar_lea.vmem [#allocation5], %s2707_s22 }
  0x5b   : > { %3178 = dma.done.wait (%p3721_p3), %s202_s7, 32  }
  0x5c   : > { %3180 = vsyncadd (%p3721_p3), %s202_s7, 4294967264  ;;  %v3219_v0 = vmov 0.0   ;;  %vm3220_vm0 = vmmov 0   ;;  %v3429_v1 = vld [vmem:[%s196_s26] sm:$0x3]  ;;  %v289_v5 = vlaneseq  ;;  %vm295_vm2 = vcmask 15360  }
  0x5d   : > { %2799 = vmatprep.subr.mxu0 %v3219_v0  ;;  %2801 = vmatprep.mubr.msk.f32.mxu0 %vm3220_vm0, %v3219_v0  ;;  %v243_v2 = vand.u32 2147483647, %v3429_v1  ;;  %v3442_v13 = vld [vmem:[%s205_s3] sm:$0x3]  ;;  %vm249_vm3 = vcmp.ge.f32.partialorder %v3429_v1, 0.0  ;;  %vm299_vm5 = vcmask 1041408  }
  0x5e   : > { %2804 = vmatprep.subr.mxu1 %v3219_v0  ;;  %2806 = vmatprep.mubr.msk.f32.mxu1 %vm3220_vm0, %v3219_v0  ;;  %v290_v6 = vshrl.u32 %v289_v5, 7  ;;  %vm242_vm4 = vcmp.ne.f32.partialorder %v3442_v13, 0.0  ;;  %v254_v37 = vmax.f32 %v3429_v1, 0.0  ;;  %s2951_s24 = smul.u32 40, %s3410_s8  ;;  %s2564_s17 = scalar_lea.sflag [#allocation4], %s3410_s8 }
  0x5f   : > { %v244_v3 = vsub.f32 0.0, %v243_v2  ;;  %v3453_v18 = vsel %vm242_vm4, 1.0, %v3219_v0  ;;  %v255_v38 = vsel %vm242_vm4, %v3429_v1, 0.0  ;;  %s2952_s18 = smul.u32 5, %s3199_s12  ;;  %p3726_p0 = scmp.ne.s32.totalorder %s3714_s25, 0 }
  0x60   : > { %vm291_vm1 = vcmp.eq.s32.totalorder %v290_v6, 0  ;;  %v754_v24 = vsel %vm299_vm5, %v3453_v18, 0  ;;  %v256_v45 = vsub.f32 %v254_v37, %v255_v38  ;;  %s3637_s21 = scalar_lea.vmem [#allocation7], %s2951_s24  ;;  %s2953_s6 = smul.u32 10, %s3203_s13 }
  0x61   : > { %v245_v4 = vmul.f32 1.442695, %v244_v3  ;;  %v3433_v7 = vsel %vm291_vm1, 1.0, %v3219_v0  ;;  %v834_v28 = vsub.f32 %v754_v24, %v754_v24  ;;  %s2579_s27 = sshll.u32 %s3637_s21, 4  ;;  %s3221_s23 = smov [#allocation7]   ;;  %s3651_s27 = int_to_ptr.vmem [resolvable:$true] %s2579_s27 }
  0x62   : > { %v297_v10 = vsel %vm295_vm2, %v3433_v7, 0  ;;  %s2576_s5 = sadd.s32 %s2953_s6, %s2952_s18  ;;  %s3113_s22 = scalar_lea.vmem %s3651_s27, 640 }
  0x63   : > { %3041 = vpow2.f32 %v245_v4  ;;  %v3437_v11 = vsub.f32 %v297_v10, %v297_v10  ;;  %v835_v35 = vand.u32 4294901760, %v834_v28  ;;  %s2736_s29 = sshll.u32 %s2576_s5, 7  ;;  %p3114_p8 = scmp.ne.s32.totalorder %s3651_s27, %s3113_s22 }
  0x64   : > { %s3649_s4 = scalar_lea.hbm %s3708_s2, %s2736_s29  ;;  %s3117_s26 = sshll.u32 %s3221_s23, 4  ;;  %s3118_s26 = int_to_ptr.vmem [resolvable:$false] %s3117_s26 }
  0x65   : > { %v3440_v12 = vand.u32 4294901760, %v3437_v11  ;;  %v836_v42 = vsub.f32 %v834_v28, %v835_v35  ;;  %p3115_p12 = pnand %p3114_p8, %p3726_p0  ;;  %s3119_s7 = scalar_lea.vmem %s3118_s26, 1280 }
  0x66   : > { %p3120_p7 = scmp.lt.s32.totalorder %s3651_s27, %s3118_s26  ;;  %p3121_p10 = scmp.lt.s32.totalorder %s3119_s7, %s3113_s22 }
  0x67   : > { %v372_v15 = vsub.f32 %v3437_v11, %v3440_v12  ;;  %v837_v48 = vand.u32 4294901760, %v836_v42  ;;  %p3116_p6 = pneg %p3115_p12 }
  0x68   : > { %p3122_p1 = por %p3121_p10, %p3120_p7 }
  0x69   : > { %v3458_v21 = vand.u32 4294901760, %v372_v15 }
  0x6a   : > { %p3123_p9 = pnand %p3122_p1, %p3116_p6 }
  0x6d   : > { %v3042_v8 = vpop.eup %3041 }
  0x6e   : > { %v247_v9 = vadd.f32 1.0, %v3042_v8  ;;  %v260_v26 = vmul.f32 -0.5, %v3042_v8  ;;  %v263_v33 = vand.u32 2147483647, %v3042_v8 }
  0x70   : > { %3043 = vrcp.f32 %v247_v9  ;;  %v261_v31 = vadd.f32 1.0, %v260_v26  ;;  %vm3482_vm6 = vcmp.lt.f32.partialorder %v263_v33, 0.0004427343 }
  0x71   : > { %3045 = vlog2.f32 %v247_v9 }
  0x72   : > { %v262_v40 = vmul.f32 %v3042_v8, %v261_v31 }
  0x7a   : > { %v3044_v14 = vpop.eup %3043 }
  0x7b   : > { %v250_v16 = vmul.f32 %v3044_v14, %v3042_v8  ;;  %v3046_v32 = vpop.eup %3045 }
  0x7c   : > { %v259_v39 = vmul.f32 0.6931472, %v3046_v32 }
  0x7d   : > { %v3448_v17 = vsel %vm249_vm3, %v3044_v14, %v250_v16 }
  0x7e   : > { %v267_v19 = vsub.f32 0.0, %v3448_v17  ;;  %v301_v20 = vsel %vm299_vm5, %v3448_v17, 0  ;;  %v253_v30 = vsel %vm242_vm4, %v3448_v17, 0.0  ;;  %v265_v46 = vsel %vm3482_vm6, %v262_v40, %v259_v39 }
  0x7f   : > { %v304_v22 = vand.u32 4294901760, %v301_v20  ;;  %v1207_v36 = vsel %vm299_vm5, %v253_v30, 0  ;;  %v266_v50 = vadd.f32 %v265_v46, %v256_v45  ;;  %v284_v5 = vsel %vm242_vm4, 0.0, %v3448_v17 }
  0x80   : > { %v268_v23 = vmul.f32 1.442695, %v267_v19  ;;  %v3488_v43 = vand.u32 4294901760, %v1207_v36 }
  0x81   : > { %2800 = vmatpush3.msra.mxu0 %v304_v22  ;;  %v381_v25 = vsub.f32 %v301_v20, %v304_v22  ;;  %v1660_v53 = vsel %vm299_vm5, %v266_v50, 0 }
  0x82   : > { %3047 = vpow2.f32 %v268_v23  ;;  %2802 = vmatmul.mubr.f32.vlgmr.msra.gmra.mrb[0].mxu0 %v3458_v21  ;;  %2809 = vmatprep.subr.mxu0 %v3219_v0  ;;  %v1287_v49 = vsub.f32 %v1207_v36, %v3488_v43  ;;  %v3525_v57 = vand.u32 4294901760, %v1660_v53 }
  0x83   : > { %v382_v27 = vand.u32 4294901760, %v381_v25  ;;  %2810 = vmatpush3.msra.mxu0 %v381_v25  ;;  %2811 = vmatprep.mubr.msk.f32.mxu0 %vm3220_vm0, %v3219_v0 }
  0x84   : > { %2819 = vmatprep.subr.mxu0 %v3219_v0  ;;  %v1288_v52 = vand.u32 4294901760, %v1287_v49  ;;  %v1740_v1 = vsub.f32 %v1660_v53, %v3525_v57 }
  0x85   : > { %v383_v29 = vsub.f32 %v381_v25, %v382_v27 }
  0x86   : > { %2812 = vmatmul.mubr.f32.vlgmr.msra.gmra.mrb[2].mxu0 %v3437_v11  ;;  %v1289_v56 = vsub.f32 %v1287_v49, %v1288_v52  ;;  %v1741_v9 = vand.u32 4294901760, %v1740_v1 }
  0x87   : > { %v384_v34 = vand.u32 4294901760, %v383_v29  ;;  %2820 = vmatpush3.msra.mxu0 %v382_v27  ;;  %2821 = vmatprep.mubr.msk.f32.mxu0 %vm3220_vm0, %v3219_v0 }
  0x88   : > { %2829 = vmatprep.subr.mxu0 %v3219_v0  ;;  %v1290_v63 = vand.u32 4294901760, %v1289_v56  ;;  %v1742_v15 = vsub.f32 %v1740_v1, %v1741_v9 }
  0x89   : > { %2805 = vmatpush3.msra.mxu1 %v384_v34 }
  0x8a   : > { %2807 = vmatmul.mubr.msk.f32.vlgmr.msra.gmra.mrb[0].mxu1 %vm295_vm2, %v3433_v7  ;;  %2814 = vmatprep.subr.mxu1 %v3219_v0 }
  0x8b   : > { %2815 = vmatpush3.msra.mxu1 %v304_v22  ;;  %2816 = vmatprep.mubr.msk.f32.mxu1 %vm3220_vm0, %v3219_v0 }
  0x8c   : > { %v3048_v44 = vpop.eup %3047  ;;  %2824 = vmatprep.subr.mxu1 %v3219_v0  ;;  %2822 = vmatmul.mubr.msk.f32.vlgmr.msra.gmra.mrb[4].mxu0 %vm295_vm2, %v3433_v7 }
  0x8d   : > { %2830 = vmatpush3.msk.msra.mxu0 %vm299_vm5, %v3453_v18  ;;  %2831 = vmatprep.mubr.msk.f32.mxu0 %vm3220_vm0, %v3219_v0  ;;  %v270_v47 = vadd.f32 1.0, %v3048_v44  ;;  %v277_v51 = vmul.f32 -0.5, %v3048_v44  ;;  %v280_v55 = vand.u32 2147483647, %v3048_v44 }
  0x8e   : > { %2817 = vmatmul.mubr.f32.vlgmr.msra.gmra.mrb[2].mxu1 %v3440_v12  ;;  %2839 = vmatprep.subr.mxu0 %v3219_v0 }
  0x8f   : > { %2825 = vmatpush3.msra.mxu1 %v304_v22  ;;  %2826 = vmatprep.mubr.msk.f32.mxu1 %vm3220_vm0, %v3219_v0  ;;  %3049 = vrcp.f32 %v270_v47  ;;  %v278_v54 = vadd.f32 1.0, %v277_v51  ;;  %vm3535_vm7 = vcmp.lt.f32.partialorder %v280_v55, 0.0004427343 }
  0x90   : > { %2834 = vmatprep.subr.mxu1 %v3219_v0  ;;  %2832 = vmatmul.mubr.f32.vlgmr.msra.gmra.mrb[6].mxu0 %v3458_v21  ;;  %3051 = vlog2.f32 %v270_v47 }
  0x91   : > { %2840 = vmatpush3.msra.mxu0 %v834_v28  ;;  %2841 = vmatprep.mubr.msk.f32.mxu0 %vm3220_vm0, %v3219_v0  ;;  %v279_v59 = vmul.f32 %v3048_v44, %v278_v54 }
  0x92   : > { %2827 = vmatmul.mubr.msk.f32.vlgmr.msra.gmra.mrb[4].mxu1 %vm295_vm2, %v3433_v7  ;;  %2849 = vmatprep.subr.mxu0 %v3219_v0 }
  0x93   : > { %2835 = vmatpush3.msra.mxu1 %v837_v48  ;;  %2836 = vmatprep.mubr.msk.f32.mxu1 %vm3220_vm0, %v3219_v0 }
  0x94   : > { %2844 = vmatprep.subr.mxu1 %v3219_v0  ;;  %2842 = vmatmul.mubr.f32.vlgmr.msra.gmra.mrb[8].mxu0 %v3437_v11 }
  0x95   : > { %2850 = vmatpush3.msra.mxu0 %v835_v35  ;;  %2851 = vmatprep.mubr.msk.f32.mxu0 %vm3220_vm0, %v3219_v0 }
  0x96   : > { %2837 = vmatmul.mubr.msk.f32.vlgmr.msra.gmra.mrb[6].mxu1 %vm295_vm2, %v3433_v7  ;;  %2859 = vmatprep.subr.mxu0 %v3219_v0 }
  0x97   : > { %2845 = vmatpush3.msk.msra.mxu1 %vm299_vm5, %v3453_v18  ;;  %2846 = vmatprep.mubr.msk.f32.mxu1 %vm3220_vm0, %v3219_v0 }
  0x98   : > { %2854 = vmatprep.subr.mxu1 %v3219_v0  ;;  %2852 = vmatmul.mubr.msk.f32.vlgmr.msra.gmra.mrb[10].mxu0 %vm295_vm2, %v3433_v7 }
  0x99   : > { %v3050_v58 = vpop.eup %3049  ;;  %2860 = vmatpush3.msra.mxu0 %v3488_v43  ;;  %2861 = vmatprep.mubr.msk.f32.mxu0 %vm3220_vm0, %v3219_v0 }
  0x9a   : > { %v3052_v60 = vpop.eup %3051  ;;  %2847 = vmatmul.mubr.f32.vlgmr.msra.gmra.mrb[8].mxu1 %v3440_v12  ;;  %2869 = vmatprep.subr.mxu0 %v3219_v0  ;;  %v272_v61 = vmul.f32 %v3050_v58, %v3048_v44 }
  0x9b   : > { %2855 = vmatpush3.msk.msra.mxu1 %vm299_vm5, %v3453_v18  ;;  %2856 = vmatprep.mubr.msk.f32.mxu1 %vm3220_vm0, %v3219_v0  ;;  %v276_v2 = vmul.f32 0.6931472, %v3052_v60  ;;  %v1743_v18 = vand.u32 4294901760, %v1742_v15 }
  0x9c   : > { %2864 = vmatprep.subr.mxu1 %v3219_v0  ;;  %2862 = vmatmul.mubr.f32.vlgmr.msra.gmra.mrb[12].mxu0 %v3458_v21  ;;  %v273_v3 = vsel %vm242_vm4, %v272_v61, %v3050_v58 }
  0x9d   : > { %2870 = vmatpush3.msra.mxu0 %v1287_v49  ;;  %2871 = vmatprep.mubr.msk.f32.mxu0 %vm3220_vm0, %v3219_v0  ;;  %v282_v4 = vsel %vm3535_vm7, %v279_v59, %v276_v2  ;;  %v286_v6 = vmul.f32 %v273_v3, %v273_v3 }
  0x9e   : > { %2857 = vmatmul.mubr.msk.f32.vlgmr.msra.gmra.mrb[10].mxu1 %vm295_vm2, %v3433_v7  ;;  %2879 = vmatprep.subr.mxu0 %v3219_v0  ;;  %v283_v8 = vsub.f32 0.0, %v282_v4 }
  0x9f   : > { %2865 = vmatpush3.msra.mxu1 %v1290_v63  ;;  %2866 = vmatprep.mubr.msk.f32.mxu1 %vm3220_vm0, %v3219_v0  ;;  %v287_v10 = vsub.f32 0.0, %v286_v6 }
  0xa0   : > { %2874 = vmatprep.subr.mxu1 %v3219_v0  ;;  %2872 = vmatmul.mubr.f32.vlgmr.msra.gmra.mrb[14].mxu0 %v3437_v11  ;;  %v285_v14 = vsub.f32 %v283_v8, %v284_v5 }
  0xa1   : > { %2880 = vmatpush3.msra.mxu0 %v1288_v52  ;;  %2881 = vmatprep.mubr.msk.f32.mxu0 %vm3220_vm0, %v3219_v0 }
  0xa2   : > { %2867 = vmatmul.mubr.msk.f32.vlgmr.msra.gmra.mrb[12].mxu1 %vm295_vm2, %v3433_v7  ;;  %2889 = vmatprep.subr.mxu0 %v3219_v0  ;;  %v288_v13 = vmul.f32 %v287_v10, %v285_v14 }
  0xa3   : > { %2875 = vmatpush3.msra.mxu1 %v3488_v43  ;;  %2876 = vmatprep.mubr.msk.f32.mxu1 %vm3220_vm0, %v3219_v0 }
  0xa4   : > { %2884 = vmatprep.subr.mxu1 %v3219_v0  ;;  %2882 = vmatmul.mubr.msk.f32.vlgmr.msra.gmra.mrb[16].mxu0 %vm295_vm2, %v3433_v7  ;;  %v2113_v16 = vsel %vm299_vm5, %v288_v13, 0 }
  0xa5   : > { %2890 = vmatpush3.msra.mxu0 %v3525_v57  ;;  %2891 = vmatprep.mubr.msk.f32.mxu0 %vm3220_vm0, %v3219_v0  ;;  %v2116_v17 = vand.u32 4294901760, %v2113_v16 }
  0xa6   : > { %2877 = vmatmul.mubr.f32.vlgmr.msra.gmra.mrb[14].mxu1 %v3440_v12  ;;  %2899 = vmatprep.subr.mxu0 %v3219_v0 }
  0xa7   : > { %2885 = vmatpush3.msra.mxu1 %v3488_v43  ;;  %2886 = vmatprep.mubr.msk.f32.mxu1 %vm3220_vm0, %v3219_v0  ;;  %v2193_v19 = vsub.f32 %v2113_v16, %v2116_v17 }
  0xa8   : > { %2894 = vmatprep.subr.mxu1 %v3219_v0  ;;  %2892 = vmatmul.mubr.f32.vlgmr.msra.gmra.mrb[18].mxu0 %v3458_v21 }
  0xa9   : > { %2900 = vmatpush3.msra.mxu0 %v1740_v1  ;;  %2901 = vmatprep.mubr.msk.f32.mxu0 %vm3220_vm0, %v3219_v0  ;;  %v2194_v20 = vand.u32 4294901760, %v2193_v19 }
  0xaa   : > { %2887 = vmatmul.mubr.msk.f32.vlgmr.msra.gmra.mrb[16].mxu1 %vm295_vm2, %v3433_v7  ;;  %2909 = vmatprep.subr.mxu0 %v3219_v0 }
  0xab   : > { %2895 = vmatpush3.msra.mxu1 %v1743_v18  ;;  %2896 = vmatprep.mubr.msk.f32.mxu1 %vm3220_vm0, %v3219_v0  ;;  %v2195_v22 = vsub.f32 %v2193_v19, %v2194_v20 }
  0xac   : > { %2904 = vmatprep.subr.mxu1 %v3219_v0  ;;  %2902 = vmatmul.mubr.f32.vlgmr.msra.gmra.mrb[20].mxu0 %v3437_v11 }
  0xad   : > { %2910 = vmatpush3.msra.mxu0 %v1741_v9  ;;  %2911 = vmatprep.mubr.msk.f32.mxu0 %vm3220_vm0, %v3219_v0  ;;  %v2196_v23 = vand.u32 4294901760, %v2195_v22 }
  0xae   : > { %2897 = vmatmul.mubr.msk.f32.vlgmr.msra.gmra.mrb[18].mxu1 %vm295_vm2, %v3433_v7  ;;  %2919 = vmatprep.subr.mxu0 %v3219_v0 }
  0xaf   : > { %2905 = vmatpush3.msra.mxu1 %v3525_v57  ;;  %2906 = vmatprep.mubr.msk.f32.mxu1 %vm3220_vm0, %v3219_v0 }
  0xb0   : > { %2914 = vmatprep.subr.mxu1 %v3219_v0  ;;  %2912 = vmatmul.mubr.msk.f32.vlgmr.msra.gmra.mrb[22].mxu0 %vm295_vm2, %v3433_v7 }
  0xb1   : > { %2920 = vmatpush3.msra.mxu0 %v2116_v17  ;;  %2921 = vmatprep.mubr.msk.f32.mxu0 %vm3220_vm0, %v3219_v0 }
  0xb2   : > { %2907 = vmatmul.mubr.f32.vlgmr.msra.gmra.mrb[20].mxu1 %v3440_v12  ;;  %2929 = vmatprep.subr.mxu0 %v3219_v0 }
  0xb3   : > { %2915 = vmatpush3.msra.mxu1 %v3525_v57  ;;  %2916 = vmatprep.mubr.msk.f32.mxu1 %vm3220_vm0, %v3219_v0 }
  0xb4   : > { %2924 = vmatprep.subr.mxu1 %v3219_v0  ;;  %2922 = vmatmul.mubr.f32.vlgmr.msra.gmra.mrb[24].mxu0 %v3458_v21 }
  0xb5   : > { %2930 = vmatpush3.msra.mxu0 %v2193_v19  ;;  %2931 = vmatprep.mubr.msk.f32.mxu0 %vm3220_vm0, %v3219_v0 }
  0xb6   : > { %2917 = vmatmul.mubr.msk.f32.vlgmr.msra.gmra.mrb[22].mxu1 %vm295_vm2, %v3433_v7  ;;  %2939 = vmatprep.subr.mxu0 %v3219_v0 }
  0xb7   : > { %2925 = vmatpush3.msra.mxu1 %v2196_v23  ;;  %2926 = vmatprep.mubr.msk.f32.mxu1 %vm3220_vm0, %v3219_v0 }
  0xb8   : > { %2934 = vmatprep.subr.mxu1 %v3219_v0  ;;  %2932 = vmatmul.mubr.f32.vlgmr.msra.gmra.mrb[26].mxu0 %v3437_v11 }
  0xb9   : > { %2940 = vmatpush3.msra.mxu0 %v2194_v20  ;;  %2941 = vmatprep.mubr.msk.f32.mxu0 %vm3220_vm0, %v3219_v0 }
  0xba   : > { %2927 = vmatmul.mubr.msk.f32.vlgmr.msra.gmra.mrb[24].mxu1 %vm295_vm2, %v3433_v7 }
  0xbb   : > { %2935 = vmatpush3.msra.mxu1 %v2116_v17  ;;  %2936 = vmatprep.mubr.msk.f32.mxu1 %vm3220_vm0, %v3219_v0 }
  0xbc   : > { %2944 = vmatprep.subr.mxu1 %v3219_v0  ;;  %2942 = vmatmul.mubr.msk.f32.vlgmr.msra.gmra.mrb[28].mxu0 %vm295_vm2, %v3433_v7 }
  0xbe   : > { %2937 = vmatmul.mubr.f32.vlgmr.msra.gmra.mrb[26].mxu1 %v3440_v12 }
  0xbf   : > { %2945 = vmatpush3.msra.mxu1 %v2116_v17  ;;  %2946 = vmatprep.mubr.msk.f32.mxu1 %vm3220_vm0, %v3219_v0 }
  0xc2   : > { %2947 = vmatmul.mubr.msk.f32.vlgmr.msra.gmra.mrb[28].mxu1 %vm295_vm2, %v3433_v7 }
 0x155   : > { %v375_v11 = vpop.f32.mrb[0].mxu0 }
 0x156   : > { %v2803_v21 = vpop.f32.mrb[1].mxu0 }
 0x159   : > { %v525_v24 = vpop.f32.mrb[2].mxu0 }
 0x15a   : > { %v2813_v25 = vpop.f32.mrb[3].mxu0 }
 0x15d   : > { %v451_v26 = vpop.f32.mrb[0].mxu1 }
 0x15e   : > { %v452_v27 = vadd.f32 %v451_v26, %v375_v11  ;;  %v2808_v28 = vpop.f32.mrb[1].mxu1 }
 0x15f   : > { %v673_v29 = vpop.f32.mrb[4].mxu0 }
 0x160   : > { %v526_v30 = vadd.f32 %v525_v24, %v452_v27  ;;  %v2823_v31 = vpop.f32.mrb[5].mxu0 }
 0x161   : > { %v599_v32 = vpop.f32.mrb[2].mxu1 }
 0x162   : > { %v600_v12 = vadd.f32 %v599_v32, %v526_v30  ;;  %v2818_v33 = vpop.f32.mrb[3].mxu1 }
 0x163   : > { %v828_v34 = vpop.f32.mrb[6].mxu0 }
 0x164   : > { %v674_v35 = vadd.f32 %v673_v29, %v600_v12  ;;  %v2833_v0 = vpop.f32.mrb[7].mxu0 }
 0x165   : > { %v745_v36 = vpop.f32.mrb[4].mxu1 }
 0x166   : > { %v746_v37 = vadd.f32 %v745_v36, %v674_v35  ;;  %v2828_v7 = vpop.f32.mrb[5].mxu1 }
 0x167   : > { %v978_v38 = vpop.f32.mrb[8].mxu0 }
 0x168   : > { %v2843_v39 = vpop.f32.mrb[9].mxu0  ;;  %750 = vst [vmem:[%s3637_s21] sm:$0xff] %v746_v37 }
 0x169   : > { %v904_v40 = vpop.f32.mrb[6].mxu1 }
 0x16a   : > { %v905_v41 = vadd.f32 %v904_v40, %v828_v34  ;;  %v2838_v42 = vpop.f32.mrb[7].mxu1 }
 0x16b   : > { %v1126_v43 = vpop.f32.mrb[10].mxu0 }
 0x16c   : > { %v979_v44 = vadd.f32 %v978_v38, %v905_v41  ;;  %v2853_v45 = vpop.f32.mrb[11].mxu0 }
 0x16d   : > { %v1052_v46 = vpop.f32.mrb[8].mxu1 }
 0x16e   : > { %v1053_v47 = vadd.f32 %v1052_v46, %v979_v44  ;;  %v2848_v48 = vpop.f32.mrb[9].mxu1 }
 0x16f   : > { %v1281_v49 = vpop.f32.mrb[12].mxu0 }
 0x170   : > { %v1127_v50 = vadd.f32 %v1126_v43, %v1053_v47  ;;  %v2863_v51 = vpop.f32.mrb[13].mxu0 }
 0x171   : > { %v1198_v52 = vpop.f32.mrb[10].mxu1 }
 0x172   : > { %v1199_v53 = vadd.f32 %v1198_v52, %v1127_v50  ;;  %v2858_v54 = vpop.f32.mrb[11].mxu1 }
 0x173   : > { %v1431_v55 = vpop.f32.mrb[14].mxu0 }
 0x174   : > { %v2873_v56 = vpop.f32.mrb[15].mxu0  ;;  %2720 = vst [vmem:[%s3637_s21 + $0x8] sm:$0xff] %v1199_v53 }
 0x175   : > { %v1357_v57 = vpop.f32.mrb[12].mxu1 }
 0x176   : > { %v1358_v58 = vadd.f32 %v1357_v57, %v1281_v49  ;;  %v2868_v59 = vpop.f32.mrb[13].mxu1 }
 0x177   : > { %v1579_v60 = vpop.f32.mrb[16].mxu0 }
 0x178   : > { %v1432_v61 = vadd.f32 %v1431_v55, %v1358_v58  ;;  %v2883_v62 = vpop.f32.mrb[17].mxu0 }
 0x179   : > { %v1505_v63 = vpop.f32.mrb[14].mxu1 }
 0x17a   : > { %v1506_v1 = vadd.f32 %v1505_v63, %v1432_v61  ;;  %v2878_v2 = vpop.f32.mrb[15].mxu1 }
 0x17b   : > { %v1734_v3 = vpop.f32.mrb[18].mxu0 }
 0x17c   : > { %v1580_v4 = vadd.f32 %v1579_v60, %v1506_v1  ;;  %v2893_v5 = vpop.f32.mrb[19].mxu0 }
 0x17d   : > { %v1651_v6 = vpop.f32.mrb[16].mxu1 }
 0x17e   : > { %v1652_v8 = vadd.f32 %v1651_v6, %v1580_v4  ;;  %v2888_v9 = vpop.f32.mrb[17].mxu1 }
 0x17f   : > { %v1884_v10 = vpop.f32.mrb[20].mxu0 }
 0x180   : > { %v2903_v14 = vpop.f32.mrb[21].mxu0  ;;  %2725 = vst [vmem:[%s3637_s21 + $0x10] sm:$0xff] %v1652_v8 }
 0x181   : > { %v1810_v13 = vpop.f32.mrb[18].mxu1 }
 0x182   : > { %v1811_v15 = vadd.f32 %v1810_v13, %v1734_v3  ;;  %v2898_v16 = vpop.f32.mrb[19].mxu1 }
 0x183   : > { %v2032_v17 = vpop.f32.mrb[22].mxu0 }
 0x184   : > { %v1885_v18 = vadd.f32 %v1884_v10, %v1811_v15  ;;  %v2913_v19 = vpop.f32.mrb[23].mxu0 }
 0x185   : > { %v1958_v20 = vpop.f32.mrb[20].mxu1 }
 0x186   : > { %v1959_v22 = vadd.f32 %v1958_v20, %v1885_v18  ;;  %v2908_v23 = vpop.f32.mrb[21].mxu1 }
 0x187   : > { %v2187_v11 = vpop.f32.mrb[24].mxu0 }
 0x188   : > { %v2033_v21 = vadd.f32 %v2032_v17, %v1959_v22  ;;  %v2923_v24 = vpop.f32.mrb[25].mxu0 }
 0x189   : > { %v2104_v25 = vpop.f32.mrb[22].mxu1 }
 0x18a   : > { %v2105_v26 = vadd.f32 %v2104_v25, %v2033_v21  ;;  %v2918_v27 = vpop.f32.mrb[23].mxu1 }
 0x18b   : > { %v2337_v28 = vpop.f32.mrb[26].mxu0 }
 0x18c   : > { %v2933_v29 = vpop.f32.mrb[27].mxu0  ;;  %2730 = vst [vmem:[%s3637_s21 + $0x18] sm:$0xff] %v2105_v26 }
 0x18d   : > { %v2263_v30 = vpop.f32.mrb[24].mxu1 }
 0x18e   : > { %v2264_v31 = vadd.f32 %v2263_v30, %v2187_v11  ;;  %v2928_v32 = vpop.f32.mrb[25].mxu1 }
 0x18f   : > { %v2485_v12 = vpop.f32.mrb[28].mxu0 }
 0x190   : > { %v2338_v33 = vadd.f32 %v2337_v28, %v2264_v31  ;;  %v2943_v34 = vpop.f32.mrb[29].mxu0 }
 0x191   : > { %v2411_v35 = vpop.f32.mrb[26].mxu1 }
 0x192   : > { %v2412_v0 = vadd.f32 %v2411_v35, %v2338_v33  ;;  %v2938_v36 = vpop.f32.mrb[27].mxu1 }
 0x194   : > { %v2486_v37 = vadd.f32 %v2485_v12, %v2412_v0 }
 0x195   : > { %v2557_v7 = vpop.f32.mrb[28].mxu1 }
 0x196   : > { %v2558_v38 = vadd.f32 %v2557_v7, %v2486_v37  ;;  %v2948_v39 = vpop.f32.mrb[29].mxu1 }
 0x198   : > { %2735 = vst [vmem:[%s3637_s21 + $0x20] sm:$0xff] %v2558_v38 }
 0x199   : > { %3126 = shalt.err (!%p3123_p9)
}
 0x19a   : > { %s3127_s3 = scalar_lea.hbm %s3649_s4, 640  ;;  %s3131_s18 = scalar_lea.hbm %s3708_s2, 3840 }
 0x19b   : > { %p3128_p5 = scmp.ne.s32.totalorder %s3649_s4, %s3127_s3  ;;  %p3132_p4 = scmp.lt.u32.totalorder %s3649_s4, %s3708_s2 }
 0x19c   : > { %p3133_p13 = scmp.lt.u32.totalorder %s3131_s18, %s3127_s3  ;;  %p3135_p8 = scmp.lt.u32.totalorder %s3127_s3, %s3649_s4 }
 0x19d   : > { %p3129_p11 = pnand %p3128_p5, %p3726_p0 }
 0x19e   : > { %p3134_p3 = por %p3133_p13, %p3132_p4 }
 0x19f   : > { %p3130_p2 = pneg %p3129_p11 }
 0x1a0   : > { %p3136_p12 = por %p3135_p8, %p3134_p3 }
 0x1a2   : > { %p3137_p6 = pnand %p3136_p12, %p3130_p2 }
 0x1a4   : > { %3140 = shalt.err (!%p3137_p6)
}
 0x1a5   : > { %s3222_s29 = smov 128   ;;  %s3223_s12 = smov 8  }
 0x1a6   : > { %2958 = dma.vmem_to_hbm [thread:$0]  (%p3726_p0), %s3651_s27, 640, %s3649_s4, %s2564_s17, %s3222_s29, %s3222_s29, %s3223_s12  }
 0x1a7 PF: > { %p2972_p7 = scmp.ge.s32.totalorder %s3215_s16, 2  ;;  %s2594_s13 = sand.u32 1, %s3187_s9  }
 0x1a8   : > { %p3727_p10 = scmp.ne.s32.totalorder %s3715_s28, 0  ;;  %s2595_s22 = scalar_lea.sflag [#allocation4], %s2594_s13 }
 0x1aa   : > { %p2968_p1 = pnand %p2972_p7, %p3727_p10 }
 0x1ac   : > { %3182 = dma.done.wait (!%p2968_p1), %s2595_s22, 640  }
 0x1ad   : > { %3184 = vsyncadd (!%p2968_p1), %s2595_s22, 4294966656  ;;  %s21_s16 = sadd.s32 1, %s3215_s16   ;;  %s3728_s9 = smov %s3191_s10 }
 0x1ae   : > { %p18_p9 = scmp.ge.s32.totalorder %s21_s16, 8   ;;  %s3729_s10 = smov %s3195_s11 }
 0x1af   : > { %s3730_s11 = smov %s3319_s30  ;;  %s3731_s12 = smov %s3207_s14 }
 0x1b0   : > { %s3732_s13 = smov %s3211_s15  ;;  %s3733_s14 = smov %s3736_s19 }
 0x1b1   : > { %s3734_s15 = smov %s3740_s20  ;;  %20 = sbr.rel (!%p18_p9) target bundleno = 9 (0x9), region = 94 }
 0x1b8   :  { %2600 = vsyncpa [#allocation3], 1 }
 0x1b9   :  { %2602 = vsyncpa [#allocation3 + $0x1], 1 }
 0x1ba   :  { %2603 = vsyncpa [#allocation6], 1 }
 0x1bb   :  { %2605 = vsyncpa [#allocation6 + $0x1], 1 }
 0x1bc   :  { %2606 = vsyncpa [#allocation4], 1 }
 0x1bd   :  { %2608 = vsyncpa [#allocation4 + $0x1], 1 }

</bundles_post_ra>
